<compile_context>
chip_gen: v6e
topology: v6e:2x2x1
jax: 0.10.0
libtpu: 0.0.40
codegen_flags: <defaults>
</compile_context>

<pallas_src>
import jax
import jax.numpy as jnp
from jax.experimental import pallas as pl
from jax.experimental.pallas import tpu as pltpu


def _boundary_aware_kernel(x_ref, w1_ref, w2_ref, b_ref, o_ref):
    C = o_ref.shape[1]            # in_channels
    C1 = w1_ref.shape[0]          # C + Cq_pad   (fused stage-1 output rows)
    x = x_ref[0]                  # [C, TN]

    b_all = b_ref[...]            # [(C1 + 2C), 1]
    b1 = b_all[:C1]               # stage-1 bias (folded BN), pad rows are 0
    b2 = b_all[C1:]               # stage-2 bias [boundary ; attention]

    # Stage 1: fused [boundary conv1 ; attention conv1] (+folded BN) -> ReLU
    # NOTE: default MXU precision (bf16 passes) -- matches the pure-JAX
    # reference; pass precision=lax.Precision.HIGHEST here if bit-faithfulness
    # to a true f32 PyTorch forward is required (cheap: kernel is memory-bound).
    h = jnp.dot(w1_ref[...], x, preferred_element_type=jnp.float32) + b1
    h = jnp.maximum(h, 0.0)                                            # [C1, TN]

    # Stage 2: single block-diagonal push [[w2, 0], [0, wa2_pad]] @ h
    y = jnp.dot(w2_ref[...], h, preferred_element_type=jnp.float32) + b2   # [2C, TN]
    bfeat = jnp.maximum(y[:C], 0.0)                                    # boundary_feat
    att = jax.nn.sigmoid(y[C:])                                        # attention_weights

    # enhanced_feat = x + boundary_feat * attention_weights
    o_ref[0] = x + bfeat * att


def _fold_bn(w, b, gamma, beta, mean, var, eps=1e-5):
    """Fold eval-mode BatchNorm1d into a preceding 1x1 conv.

    w: [C_out, C_in], b: [C_out].  Returns (w_f, b_f) such that
    BN(conv(x)) == w_f @ x + b_f (per point).
    """
    s = gamma / jnp.sqrt(var + eps)                                    # [C_out]
    return w * s[:, None], (b - mean) * s + beta


def _pick_tile_n(N, C, max_tile_n, vmem_budget_bytes=24 << 20):
    """Largest lane-dense (multiple-of-128) divisor of N within budget/cap."""
    # double-buffered in + out blocks (f32), per point
    bytes_per_point = 2 * 2 * C * 4
    budget_tile = max(128, (vmem_budget_bytes // bytes_per_point) // 128 * 128)
    cap = min(max_tile_n, budget_tile, N)

    t = (cap // 128) * 128
    while t >= 128:
        if N % t == 0:
            return t
        t -= 128
    # No multiple-of-128 divisor <= cap: full-N block if it fits the budget
    # (valid per Pallas "full dim" rule), else largest divisor within cap.
    if N * bytes_per_point <= vmem_budget_bytes:
        return N
    for d in range(cap, 0, -1):
        if N % d == 0:
            return d
    return N


def boundary_aware_module(x, xyz, params, *, max_tile_n=2048):
    """x: [B, C, N] float32, xyz: [B, N, 3] (unused, matches PyTorch API)."""
    del xyz  # coordinates are not used in the PyTorch forward pass
    B, C, N = x.shape
    Cq = C // 4
    Cq_pad = max(8, -(-Cq // 8) * 8)           # pad attention bottleneck to a sublane multiple
    C1 = C + Cq_pad

    # ---- fold BN into conv weights (eval semantics) ----------------------
    w1, b1 = _fold_bn(params["bw1"], params["bb1"],
                      params["bn1_g"], params["bn1_b"],
                      params["bn1_m"], params["bn1_v"])
    w2, b2 = _fold_bn(params["bw2"], params["bb2"],
                      params["bn2_g"], params["bn2_b"],
                      params["bn2_m"], params["bn2_v"])
    wa1, ba1 = _fold_bn(params["aw1"], params["ab1"],
                        params["abn_g"], params["abn_b"],
                        params["abn_m"], params["abn_v"])
    wa2, ba2 = params["aw2"], params["ab2"]

    # ---- stage-1 fused weight: [boundary conv1 ; attention conv1 (padded)] --
    wa1p = jnp.zeros((Cq_pad, C), jnp.float32).at[:Cq].set(wa1)
    ba1p = jnp.zeros((Cq_pad,), jnp.float32).at[:Cq].set(ba1)
    w_first = jnp.concatenate([w1, wa1p], axis=0)                      # [C1, C]
    b_first = jnp.concatenate([b1, ba1p])                              # [C1]

    # ---- stage-2 fused block-diagonal weight: [[w2, 0], [0, wa2_pad]] -------
    w_second = jnp.zeros((2 * C, C1), jnp.float32)
    w_second = w_second.at[:C, :C].set(w2)                             # boundary conv2 (+BN)
    w_second = w_second.at[C:, C:C + Cq].set(wa2)                      # attention conv2
    b_second = jnp.concatenate([b2, ba2])                              # [2C]

    # ---- single packed bias operand (padded entries stay exactly 0) --------
    b_all = jnp.concatenate([b_first, b_second])[:, None]              # [C1 + 2C, 1]

    # ---- tile selection: lane-dense, as large as the VMEM budget allows ----
    tile_n = _pick_tile_n(N, C, max_tile_n)
    grid = (B, N // tile_n)   # batch axis stays "parallel" so v7x's 2 TCs both get work

    rep = lambda shape: pl.BlockSpec(shape, lambda b, n: (0, 0))       # resident weights/bias

    out = pl.pallas_call(
        _boundary_aware_kernel,
        out_shape=jax.ShapeDtypeStruct((B, C, N), jnp.float32),
        grid_spec=pltpu.PrefetchScalarGridSpec(
            num_scalar_prefetch=0,
            grid=grid,
            in_specs=[
                pl.BlockSpec((1, C, tile_n), lambda b, n: (b, 0, n)),  # x tile (native NCW)
                rep((C1, C)),                                          # fused stage-1 weight
                rep((2 * C, C1)),                                      # fused stage-2 weight
                rep((C1 + 2 * C, 1)),                                  # packed biases
            ],
            out_specs=pl.BlockSpec((1, C, tile_n), lambda b, n: (b, 0, n)),
        ),
        compiler_params=pltpu.CompilerParams(
            # Both axes are independent; megacore shards them across TCs on v7x.
            dimension_semantics=("parallel", "parallel")),
    )(x, w_first, w_second, b_all)

    return out


def _reference(x, params):
    """Pure-JAX reference matching the PyTorch module (eval-mode BN)."""
    def conv1x1(h, w, b):  # h: [B, C_in, N], w: [C_out, C_in]
        return jnp.einsum('oc,bcn->bon', w, h) + b[None, :, None]

    def bn(h, g, be, m, v, eps=1e-5):
        s = g / jnp.sqrt(v + eps)
        return h * s[None, :, None] + (be - m * s)[None, :, None]

    h = conv1x1(x, params["bw1"], params["bb1"])
    h = jax.nn.relu(bn(h, params["bn1_g"], params["bn1_b"], params["bn1_m"], params["bn1_v"]))
    h = conv1x1(h, params["bw2"], params["bb2"])
    bf = jax.nn.relu(bn(h, params["bn2_g"], params["bn2_b"], params["bn2_m"], params["bn2_v"]))

    a = conv1x1(x, params["aw1"], params["ab1"])
    a = jax.nn.relu(bn(a, params["abn_g"], params["abn_b"], params["abn_m"], params["abn_v"]))
    a = conv1x1(a, params["aw2"], params["ab2"])
    att = jax.nn.sigmoid(a)
    return x + bf * att


def init_params(key, C):
    Cq = C // 4
    ks = jax.random.split(key, 8)
    scale = 0.1
    return {
        # boundary_conv: Conv1d(C,C,1) -> BN -> ReLU -> Conv1d(C,C,1) -> BN -> ReLU
        "bw1": scale * jax.random.normal(ks[0], (C, C), jnp.float32),
        "bb1": scale * jax.random.normal(ks[1], (C,), jnp.float32),
        "bn1_g": jnp.ones((C,), jnp.float32), "bn1_b": jnp.zeros((C,), jnp.float32),
        "bn1_m": jnp.zeros((C,), jnp.float32), "bn1_v": jnp.ones((C,), jnp.float32),
        "bw2": scale * jax.random.normal(ks[2], (C, C), jnp.float32),
        "bb2": scale * jax.random.normal(ks[3], (C,), jnp.float32),
        "bn2_g": jnp.ones((C,), jnp.float32), "bn2_b": jnp.zeros((C,), jnp.float32),
        "bn2_m": jnp.zeros((C,), jnp.float32), "bn2_v": jnp.ones((C,), jnp.float32),
        # attention: Conv1d(C,C//4,1) -> BN -> ReLU -> Conv1d(C//4,C,1) -> Sigmoid
        "aw1": scale * jax.random.normal(ks[4], (Cq, C), jnp.float32),
        "ab1": scale * jax.random.normal(ks[5], (Cq,), jnp.float32),
        "abn_g": jnp.ones((Cq,), jnp.float32), "abn_b": jnp.zeros((Cq,), jnp.float32),
        "abn_m": jnp.zeros((Cq,), jnp.float32), "abn_v": jnp.ones((Cq,), jnp.float32),
        "aw2": scale * jax.random.normal(ks[6], (C, Cq), jnp.float32),
        "ab2": scale * jax.random.normal(ks[7], (C,), jnp.float32),
    }


if __name__ == "__main__":
    key = jax.random.PRNGKey(0)
    B, C, N = 2, 16, 1024        # in_channels=16 -> attention bottleneck = 4
    kx, kxyz, kp = jax.random.split(key, 3)
    x = jax.random.normal(kx, (B, C, N), jnp.float32)
    xyz = jax.random.normal(kxyz, (B, N, 3), jnp.float32)
    params = init_params(kp, C)

    out = boundary_aware_module(x, xyz, params)
    out = jax.block_until_ready(out)

    ref = _reference(x, params)
    assert out.shape == (B, C, N)
    assert jnp.allclose(out, ref, atol=1e-5, rtol=1e-5), "mismatch vs pure-JAX reference"
    print("KERNEL_OK")
</pallas_src>

<mosaic_0001>
module attributes {stable_mosaic.version = 11 : i64} {
  func.func @_boundary_aware_kernel(%arg0: i32, %arg1: i32, %arg2: memref<1x16x1024xf32, #tpu.memory_space<vmem>>, %arg3: memref<24x16xf32, #tpu.memory_space<vmem>>, %arg4: memref<32x24xf32, #tpu.memory_space<vmem>>, %arg5: memref<56x1xf32, #tpu.memory_space<vmem>>, %arg6: memref<1x16x1024xf32, #tpu.memory_space<vmem>>) attributes {dimension_semantics = [#tpu.dimension_semantics<parallel>, #tpu.dimension_semantics<parallel>], iteration_bounds = array<i64: 2, 1>, scalar_prefetch = 0 : i64, scratch_operands = 0 : i64, tpu.core_type = #tpu.core_type<tc>, window_params = [{transform_indices = @transform_0, window_bounds = array<i64: 1, 16, 1024>}, {pipeline_mode = #tpu.pipeline_mode<synchronous>, transform_indices = @transform_1, window_bounds = array<i64: 24, 16>}, {pipeline_mode = #tpu.pipeline_mode<synchronous>, transform_indices = @transform_2, window_bounds = array<i64: 32, 24>}, {pipeline_mode = #tpu.pipeline_mode<synchronous>, transform_indices = @transform_3, window_bounds = array<i64: 56, 1>}, {transform_indices = @transform_4, window_bounds = array<i64: 1, 16, 1024>}]} {
    %c0 = arith.constant 0 : index
    %c0_0 = arith.constant 0 : index
    %c0_1 = arith.constant 0 : index
    %0 = vector.load %arg2[%c0, %c0_0, %c0_1] : memref<1x16x1024xf32, #tpu.memory_space<vmem>>, vector<1x16x1024xf32>
    %1 = vector.shape_cast %0 : vector<1x16x1024xf32> to vector<16x1024xf32>
    %c0_2 = arith.constant 0 : index
    %c0_3 = arith.constant 0 : index
    %2 = vector.load %arg5[%c0_2, %c0_3] : memref<56x1xf32, #tpu.memory_space<vmem>>, vector<56x1xf32>
    %3 = vector.extract_strided_slice %2 {offsets = [0, 0], sizes = [24, 1], strides = [1, 1]} : vector<56x1xf32> to vector<24x1xf32>
    %4 = vector.extract_strided_slice %2 {offsets = [24, 0], sizes = [32, 1], strides = [1, 1]} : vector<56x1xf32> to vector<32x1xf32>
    %c0_4 = arith.constant 0 : index
    %c0_5 = arith.constant 0 : index
    %5 = vector.load %arg3[%c0_4, %c0_5] : memref<24x16xf32, #tpu.memory_space<vmem>>, vector<24x16xf32>
    %cst = arith.constant dense<0.000000e+00> : vector<24x1024xf32>
    %6 = tpu.matmul %5, %1, %cst {dimension_numbers = #tpu.dot_dimension_numbers<[1], [0], [0], [1], [0, 0, 1, 1], [], []>} : vector<24x16xf32>, vector<16x1024xf32>, vector<24x1024xf32> -> vector<24x1024xf32>
    %7 = vector.broadcast %3 : vector<24x1xf32> to vector<24x1024xf32>
    %8 = arith.addf %6, %7 : vector<24x1024xf32>
    %cst_6 = arith.constant 0.000000e+00 : f32
    %9 = vector.broadcast %cst_6 : f32 to vector<24x1024xf32>
    %10 = arith.maximumf %8, %9 : vector<24x1024xf32>
    %c0_7 = arith.constant 0 : index
    %c0_8 = arith.constant 0 : index
    %11 = vector.load %arg4[%c0_7, %c0_8] : memref<32x24xf32, #tpu.memory_space<vmem>>, vector<32x24xf32>
    %cst_9 = arith.constant dense<0.000000e+00> : vector<32x1024xf32>
    %12 = tpu.matmul %11, %10, %cst_9 {dimension_numbers = #tpu.dot_dimension_numbers<[1], [0], [0], [1], [0, 0, 1, 1], [], []>} : vector<32x24xf32>, vector<24x1024xf32>, vector<32x1024xf32> -> vector<32x1024xf32>
    %13 = vector.broadcast %4 : vector<32x1xf32> to vector<32x1024xf32>
    %14 = arith.addf %12, %13 : vector<32x1024xf32>
    %15 = vector.extract_strided_slice %14 {offsets = [0, 0], sizes = [16, 1024], strides = [1, 1]} : vector<32x1024xf32> to vector<16x1024xf32>
    %cst_10 = arith.constant 0.000000e+00 : f32
    %16 = vector.broadcast %cst_10 : f32 to vector<16x1024xf32>
    %17 = arith.maximumf %15, %16 : vector<16x1024xf32>
    %18 = vector.extract_strided_slice %14 {offsets = [16, 0], sizes = [16, 1024], strides = [1, 1]} : vector<32x1024xf32> to vector<16x1024xf32>
    %19 = arith.negf %18 : vector<16x1024xf32>
    %20 = math.exp %19 : vector<16x1024xf32>
    %cst_11 = arith.constant 1.000000e+00 : f32
    %21 = vector.broadcast %cst_11 : f32 to vector<16x1024xf32>
    %22 = arith.addf %21, %20 : vector<16x1024xf32>
    %23 = arith.divf %21, %22 : vector<16x1024xf32>
    %24 = arith.mulf %17, %23 : vector<16x1024xf32>
    %25 = arith.addf %1, %24 : vector<16x1024xf32>
    %c0_12 = arith.constant 0 : index
    %c0_13 = arith.constant 0 : index
    %c0_14 = arith.constant 0 : index
    %26 = vector.load %arg6[%c0_12, %c0_13, %c0_14] : memref<1x16x1024xf32, #tpu.memory_space<vmem>>, vector<1x16x1024xf32>
    %27 = vector.shape_cast %26 : vector<1x16x1024xf32> to vector<16x1024xf32>
    %28 = vector.shape_cast %25 : vector<16x1024xf32> to vector<1x16x1024xf32>
    tpu.vector_store %arg6[%c0_12, %c0_13, %c0_14], %28 {strides = array<i32>} : memref<1x16x1024xf32, #tpu.memory_space<vmem>>, vector<1x16x1024xf32>,
    return
  }
  func.func @transform_0(%arg0: i32, %arg1: i32) -> (i32, i32, i32) {
    %c0_i32 = arith.constant 0 : i32
    %c0_i32_0 = arith.constant 0 : i32
    return %arg0, %c0_i32, %arg1 : i32, i32, i32
  }
  func.func @transform_1(%arg0: i32, %arg1: i32) -> (i32, i32) {
    %c0_i32 = arith.constant 0 : i32
    %c0_i32_0 = arith.constant 0 : i32
    %c0_i32_1 = arith.constant 0 : i32
    return %c0_i32, %c0_i32_0 : i32, i32
  }
  func.func @transform_2(%arg0: i32, %arg1: i32) -> (i32, i32) {
    %c0_i32 = arith.constant 0 : i32
    %c0_i32_0 = arith.constant 0 : i32
    %c0_i32_1 = arith.constant 0 : i32
    return %c0_i32, %c0_i32_0 : i32, i32
  }
  func.func @transform_3(%arg0: i32, %arg1: i32) -> (i32, i32) {
    %c0_i32 = arith.constant 0 : i32
    %c0_i32_0 = arith.constant 0 : i32
    %c0_i32_1 = arith.constant 0 : i32
    return %c0_i32, %c0_i32_0 : i32, i32
  }
  func.func @transform_4(%arg0: i32, %arg1: i32) -> (i32, i32, i32) {
    %c0_i32 = arith.constant 0 : i32
    %c0_i32_0 = arith.constant 0 : i32
    return %arg0, %c0_i32, %arg1 : i32, i32, i32
  }
}

</mosaic_0001>

<bundles_post_ra>
// kernel: tpu_custom_call.1
= control target key start
LH: loop header
LB: loop body
LE: loop exit
PB: predicated region body
PF: predicated region fallthrough
CT: control target
= control target key end

     0   :  { %9 = vsyncpa [#allocation3], 0  ;;  %s2116_s0 = inlined_call_operand.hbm [shape: f32[2,16,1024], index: 0, kind: input, shape index: {}]   ;;  %s2117_s1 = inlined_call_operand.vmem [shape: f32[24,16], index: 1, kind: input, shape index: {}]   ;;  %s2118_s2 = inlined_call_operand.vmem [shape: f32[32,24], index: 2, kind: input, shape index: {}]   ;;  %s2119_s3 = inlined_call_operand.vmem [shape: f32[56,1], index: 3, kind: input, shape index: {}]   ;;  %s2120_s4 = inlined_call_operand.hbm [shape: f32[2,16,1024], index: 4, kind: output, shape index: {}]  }
   0x1   :  { %11 = vsyncpa [#allocation3 + $0x1], 0 }
   0x2   :  { %12 = vsyncpa [#allocation4], 0 }
   0x3   :  { %14 = vsyncpa [#allocation4 + $0x1], 0  ;;  %s1637_s15 = smov 0   ;;  %s1639_s16 = smov 0  }
   0x4   :  { %s1641_s17 = smov 0   ;;  %s1643_s18 = smov 0  }
   0x5   :  { %s1645_s19 = smov 0   ;;  %s1647_s20 = smov 0  }
   0x6 LB: > { %s1299_s21 = sadd.s32 4294967295, %s1602_s20   ;;  %s1300_s22 = sadd.s32 4294967294, %s1602_s20   ;;  %s1602_s20 = sphi %s1647_s20, %s20_s20   ;;  %s1598_s19 = sphi %s1645_s19, %s2131_s19   ;;  %s1594_s18 = sphi %s1643_s18, %s2130_s18   ;;  %s1590_s17 = sphi %s1641_s17, %s2129_s17   ;;  %s1586_s16 = sphi %s1639_s16, %s2128_s16   ;;  %s1582_s15 = sphi %s1637_s15, %s2127_s15  }
   0x7   : > { %s32_s23 = sadd.s32 1, %s1598_s19  ;;  %s41_s24 = sadd.s32 1, %s1590_s17 }
   0x8   : > { %p34_p0 = scmp.ge.s32.totalorder %s32_s23, 2  ;;  %p48_p1 = scmp.ne.s32.totalorder %s1590_s17, %s1586_s16 }
   0x9   : > { %p49_p2 = scmp.eq.s32.totalorder %s1602_s20, 0  ;;  %p54_p3 = scmp.ne.s32.totalorder %s1586_s16, %s1582_s15 }
   0xa   : > { %s2133_s23 = smov (%p34_p0, %s32_s23), 0  ;;  %p55_p5 = scmp.eq.s32.totalorder %s1299_s21, 0 }
   0xb   : > { %p1678_p4 = por %p49_p2, %p48_p1  ;;  %s36_s26 = ssub.s32 %s1598_s19, %s2133_s23 }
   0xc   : > { %p143_p6 = scmp.eq.s32.totalorder %s1299_s21, 1  ;;  %p39_p7 = scmp.eq.s32.totalorder %s36_s26, 0 }
   0xd   : > { %p1684_p8 = por %p55_p5, %p54_p3  ;;  %p149_p10 = scmp.eq.s32.totalorder %s1300_s22, 1 }
   0xe   : > { %p1688_p9 = por %p143_p6, %p48_p1  ;;  %p1372_p13 = scmp.lt.s32.totalorder %s1602_s20, 2 }
   0xf   : > { %s1693_s29 = scalar_select %p39_p7, %s1590_s17, %s41_s24  }
  0x10   : > { %p1695_p11 = por %p149_p10, %p54_p3  ;;  %s178_s5 = sand.u32 1, %s1590_s17  }
  0x11   : > { %s1303_s6 = sshll.u32 %s178_s5, 7  ;;  %s1358_s7 = sshll.u32 %s1598_s19, 11 }
  0x12   : > { %s190_s10 = scalar_lea.hbm %s2116_s0, %s1358_s7  ;;  %s182_s11 = scalar_lea.vmem [#allocation2], %s1303_s6 }
  0x13   : > { %s191_s12 = sshll.u32 %s182_s11, 4  ;;  %p1708_p0 = pnand %p1372_p13, %p1678_p4  ;;  %s192_s12 = int_to_ptr.vmem [resolvable:$true] %s191_s12 }
  0x14   : > { %p1306_p1 = scmp.ge.s32.totalorder %s1602_s20, 1  ;;  %s179_s14 = scalar_lea.sflag [#allocation3], %s178_s5 }
  0x15   : > { %p1496_p2 = pneg %p1708_p0  ;;  %s1507_s21 = scalar_lea.vmem %s192_s12, 2048 }
  0x16   : > { %p1508_p3 = scmp.ne.s32.totalorder %s192_s12, %s1507_s21  ;;  %s1604_s22 = smov [#allocation2]  }
  0x17   : > { %s1512_s24 = sshll.u32 %s1604_s22, 4  ;;  %s1513_s24 = int_to_ptr.vmem [resolvable:$false] %s1512_s24 }
  0x18   : > { %p1510_p5 = pnand %p1508_p3, %p1496_p2  ;;  %s1514_s26 = scalar_lea.vmem %s1513_s24, 4096 }
  0x19   : > { %p1515_p7 = scmp.lt.s32.totalorder %s192_s12, %s1513_s24  ;;  %p1516_p10 = scmp.lt.s32.totalorder %s1514_s26, %s1507_s21 }
  0x1a   : > { %p1511_p6 = pneg %p1510_p5 }
  0x1b   : > { %p1517_p12 = por %p1516_p10, %p1515_p7 }
  0x1d   : > { %p1518_p4 = pnand %p1517_p12, %p1511_p6 }
  0x1f   : > { %1521 = shalt.err (!%p1518_p4)
}
  0x20   : > { %s1605_s25 = smov 1024   ;;  %s1606_s5 = smov 64  }
  0x21   : > { %1367 = dma.hbm_to_vmem [thread:$0]  (!%p1708_p0), %s190_s10, 2048, %s192_s12, %s179_s14, %s1605_s25, %s1605_s25, %s1606_s5  }
  0x22   : > { %p199_p13 = scmp.lt.s32.totalorder %s1602_s20, 3 }
  0x24   : > { %p200_p2 = pnand %p1306_p1, %p199_p13 }
  0x25   : > { %s1721_s6 = sand.u32 (!%p200_p2), 1, %s1586_s16  }
  0x26   : > { %203 = sbr.rel (%p200_p2) target bundleno = 548 (0x224), region = 36  ;;  %s1307_s7 = sshll.u32 (!%p200_p2), %s1721_s6, 7 }
  0x27   : > { %s206_s8 = scalar_lea.sflag (!%p200_p2), [#allocation3], %s1721_s6  ;;  %s1727_s9 = scalar_lea.vmem (!%p200_p2), [#allocation2], %s1307_s7 }
  0x2b   : > { %1573 = dma.done.wait (%p1684_p8), %s206_s8, 2048  }
  0x2c   : > { %1575 = vsyncadd (%p1684_p8), %s206_s8, 4294965248  ;;  %v1607_v0 = vmov 0.0   ;;  %v1608_v1 = vmov 0   ;;  %v1736_v2 = vld [vmem:[%s1727_s9 + $0x48] sm:$0xff]  ;;  %v1739_v3 = vld [vmem:[%s1727_s9 + $0x58] sm:$0xff]  ;;  %vm277_vm0 = vcmask 130048  }
  0x2d   : > { %351 = vmatprep.mubr.f32.mxu0 %v1607_v0  ;;  %434 = vmatprep.mubr.f32.mxu1 %v1607_v0  ;;  %v1742_v4 = vld [vmem:[%s1727_s9 + $0x40] sm:$0xff]  ;;  %v1747_v5 = vld [vmem:[%s1727_s9 + $0x50] sm:$0xff]  ;;  %v1750_v6 = vld [vmem:[%s1727_s9 + $0x8] sm:$0xff]  ;;  %vm667_vm1 = vcmask 195584   ;;  %s2013_s27 = scalar_lea.vmem [#allocation5], %s1307_s7  ;;  %s1359_s7 = sshll.u32 %s1594_s18, 11 }
  0x2e   : > { %1428 = vset.pattern.permute.xlu0 %v1608_v1  ;;  %1429 = vset.pattern.permute.xlu1 %v1608_v1  ;;  %v1753_v7 = vld [vmem:[%s1727_s9 + $0x18] sm:$0xff]  ;;  %v1758_v8 = vld [vmem:[%s1727_s9] sm:$0xff]  ;;  %v1761_v9 = vld [vmem:[%s1727_s9 + $0x10] sm:$0xff]  ;;  %s1212_s10 = sshll.u32 %s2013_s27, 4  ;;  %s2062_s18 = scalar_lea.hbm %s2120_s4, %s1359_s7  ;;  %s2064_s10 = int_to_ptr.vmem [resolvable:$true] %s1212_s10 }
  0x2f   : > { %315 = vmatprep.subr.mxu0 %v1736_v2  ;;  %398 = vmatprep.subr.mxu1 %v1739_v3  ;;  %v259_v10 = vld [vmem:[%s2117_s1] sm:$0xff]  ;;  %v1771_v11 = vld [vmem:[%s1727_s9 + $0x68] sm:$0xff]  ;;  %v1774_v12 = vld [vmem:[%s1727_s9 + $0x78] sm:$0xff]  ;;  %s1197_s13 = scalar_lea.sflag [#allocation4], %s1721_s6  ;;  %s1522_s14 = scalar_lea.vmem %s2064_s10, 2048 }
  0x30   : > { %316 = vmatpush1.msra.mxu0 %v1742_v4  ;;  %399 = vmatpush1.msra.mxu1 %v1747_v5  ;;  %v1779_v13 = vld [vmem:[%s1727_s9 + $0x60] sm:$0xff]  ;;  %v1782_v14 = vld [vmem:[%s1727_s9 + $0x70] sm:$0xff]  ;;  %v260_v15 = vld [vmem:[%s2117_s1 + $0x8] sm:$0xff]  ;;  %p1523_p8 = scmp.ne.s32.totalorder %s2064_s10, %s1522_s14  ;;  %s1609_s21 = smov [#allocation5]  }
  0x31   : > { %317 = vmatprep.subr.mxu0 %v1750_v6  ;;  %400 = vmatprep.subr.mxu1 %v1753_v7  ;;  %v1794_v16 = vld [vmem:[%s1727_s9 + $0x28] sm:$0xff]  ;;  %v1797_v17 = vld [vmem:[%s1727_s9 + $0x38] sm:$0xff]  ;;  %v1802_v18 = vld [vmem:[%s1727_s9 + $0x20] sm:$0xff]  ;;  %s1526_s22 = sshll.u32 %s1609_s21, 4  ;;  %s1527_s22 = int_to_ptr.vmem [resolvable:$false] %s1526_s22 }
  0x32   : > { %318 = vmatpush1.msra.mxu0 %v1758_v8  ;;  %401 = vmatpush1.msra.mxu1 %v1761_v9  ;;  %v1805_v19 = vld [vmem:[%s1727_s9 + $0x30] sm:$0xff]  ;;  %v252_v22 = vld [vmem:[%s2119_s3] sm:$0xff]  ;;  %v253_v23 = vld [vmem:[%s2119_s3 + $0x8] sm:$0xff]  ;;  %p1524_p12 = pnand %p1523_p8, %p1688_p9  ;;  %s1528_s24 = scalar_lea.vmem %s1527_s22, 4096 }
  0x33   : > { %1309 = vmatmul.mubr.msk.f32.vlgmr.msra.gmra.mxu0 %vm277_vm0, %v259_v10  ;;  %1312 = vmatmul.mubr.msk.f32.vlgmr.msra.gmra.mxu1 %vm277_vm0, %v259_v10  ;;  %v261_v20 = vld [vmem:[%s2117_s1 + $0x10] sm:$0xff]  ;;  %v257_v24 = vld [vmem:[%s2119_s3 + $0x28] sm:$0xff]  ;;  %v255_v26 = vld [vmem:[%s2119_s3 + $0x18] sm:$0xff]  ;;  %p1529_p1 = scmp.lt.s32.totalorder %s2064_s10, %s1527_s22  ;;  %p1530_p3 = scmp.lt.s32.totalorder %s1528_s24, %s1522_s14 }
  0x34   : > { %357 = vmatprep.mubr.f32.mxu0 %v1607_v0  ;;  %440 = vmatprep.mubr.f32.mxu1 %v1607_v0  ;;  %v254_v21 = vld [vmem:[%s2119_s3 + $0x10] sm:$0xff]  ;;  %v256_v27 = vld [vmem:[%s2119_s3 + $0x20] sm:$0xff]  ;;  %p1525_p0 = pneg %p1524_p12 }
  0x35   : > { %481 = vmatprep.subr.mxu0 %v1771_v11  ;;  %564 = vmatprep.subr.mxu1 %v1774_v12  ;;  %v258_v25 = vld [vmem:[%s2119_s3 + $0x30] sm:$0xff]  ;;  %p1531_p5 = por %p1530_p3, %p1529_p1 }
  0x36   : > { %482 = vmatpush1.msra.mxu0 %v1779_v13  ;;  %565 = vmatpush1.msra.mxu1 %v1782_v14 }
  0x37   : > { %1310 = vmatmul.mubr.msk.f32.gmra.mxu0 %vm277_vm0, %v260_v15  ;;  %1313 = vmatmul.mubr.msk.f32.gmra.mxu1 %vm277_vm0, %v260_v15  ;;  %p1532_p6 = pnand %p1531_p5, %p1525_p0 }
  0x38   : > { %363 = vmatprep.mubr.f32.mxu0 %v1607_v0  ;;  %446 = vmatprep.mubr.f32.mxu1 %v1607_v0 }
  0x39   : > { %483 = vmatprep.subr.mxu0 %v1794_v16  ;;  %566 = vmatprep.subr.mxu1 %v1797_v17 }
  0x3a   : > { %484 = vmatpush1.msra.mxu0 %v1802_v18  ;;  %567 = vmatpush1.msra.mxu1 %v1805_v19 }
  0x3b   : > { %1311 = vmatmul.mubr.msk.f32.gmra.mxu0 %vm277_vm0, %v261_v20  ;;  %1314 = vmatmul.mubr.msk.f32.gmra.mxu1 %vm277_vm0, %v261_v20 }
  0x3c   : > { %517 = vmatprep.mubr.f32.mxu0 %v1607_v0  ;;  %600 = vmatprep.mubr.f32.mxu1 %v1607_v0 }
  0x3d   : > { %274 = vperm.xlu0 %1428, %v254_v21   ;;  %264 = vperm.xlu1 %1429, %v252_v22  }
  0x3f   : > { %1315 = vmatmul.mubr.msk.f32.vlgmr.msra.gmra.mxu0 %vm277_vm0, %v259_v10  ;;  %1318 = vmatmul.mubr.msk.f32.vlgmr.msra.gmra.mxu1 %vm277_vm0, %v259_v10 }
  0x40   : > { %523 = vmatprep.mubr.f32.mxu0 %v1607_v0  ;;  %606 = vmatprep.mubr.f32.mxu1 %v1607_v0 }
  0x41   : > { %269 = vperm.xlu0 %1428, %v253_v23   ;;  %659 = vperm.xlu1 %1429, %v257_v24  }
  0x43   : > { %1316 = vmatmul.mubr.msk.f32.gmra.mxu0 %vm277_vm0, %v260_v15  ;;  %1319 = vmatmul.mubr.msk.f32.gmra.mxu1 %vm277_vm0, %v260_v15 }
  0x44   : > { %529 = vmatprep.mubr.f32.mxu0 %v1607_v0  ;;  %612 = vmatprep.mubr.f32.mxu1 %v1607_v0 }
  0x45   : > { %664 = vperm.xlu0 %1428, %v258_v25   ;;  %649 = vperm.xlu1 %1429, %v255_v26  }
  0x47   : > { %1317 = vmatmul.mubr.msk.f32.gmra.mxu0 %vm277_vm0, %v261_v20  ;;  %1320 = vmatmul.mubr.msk.f32.gmra.mxu1 %vm277_vm0, %v261_v20 }
  0x48   : > { %744 = vmatprep.mubr.f32.mxu0 %v1607_v0  ;;  %833 = vmatprep.mubr.f32.mxu1 %v1607_v0 }
  0x49   : > { %654 = vperm.xlu0 %1428, %v256_v27  }
  0xb8   : > { %v1853_v32 = vpop.permute.xlu0 %274  ;;  %v1859_v44 = vpop.permute.xlu1 %264 }
  0xbc   : > { %v1855_v39 = vpop.permute.xlu0 %269 }
  0xf3   : > { %v353_v28 = vpop.f32.mrf.mxu0  ;;  %v436_v29 = vpop.f32.mrf.mxu1 }
  0xf4   : > { %v354_v57 = vadd.f32 %v353_v28, %v1859_v44  ;;  %v437_v58 = vadd.f32 %v436_v29, %v1859_v44  ;;  %v1878_v28 = vld [vmem:[%s2118_s2] sm:$0xff] }
  0xf5   : > { %v355_v30 = vpop.f32.mrf.mxu0  ;;  %v438_v31 = vpop.f32.mrf.mxu1 }
  0xf6   : > { %v356_v53 = vadd.f32 %v355_v30, %v1859_v44  ;;  %v439_v54 = vadd.f32 %v438_v31, %v1859_v44  ;;  %v619_v24 = vmax.f32 %v354_v57, 0.0  ;;  %v621_v25 = vmax.f32 %v437_v58, 0.0 }
  0xf7   : > { %v359_v33 = vpop.f32.mrf.mxu0  ;;  %v442_v34 = vpop.f32.mrf.mxu1 }
  0xf8   : > { %v360_v49 = vadd.f32 %v359_v33, %v1855_v39  ;;  %v443_v50 = vadd.f32 %v442_v34, %v1855_v39  ;;  %v620_v22 = vmax.f32 %v356_v53, 0.0  ;;  %v622_v23 = vmax.f32 %v439_v54, 0.0 }
  0xf9   : > { %v361_v35 = vpop.f32.mrf.mxu0  ;;  %v444_v36 = vpop.f32.mrf.mxu1 }
  0xfa   : > { %v362_v45 = vadd.f32 %v361_v35, %v1855_v39  ;;  %v445_v46 = vadd.f32 %v444_v36, %v1855_v39  ;;  %v627_v10 = vmax.f32 %v360_v49, 0.0  ;;  %v629_v15 = vmax.f32 %v443_v50, 0.0  ;;  %v644_v36 = vld [vmem:[%s2118_s2 + $0x8] sm:$0xff] }
  0xfb   : > { %v365_v37 = vpop.f32.mrf.mxu0  ;;  %v448_v38 = vpop.f32.mrf.mxu1 }
  0xfc   : > { %v366_v40 = vadd.f32 %v365_v37, %v1853_v32  ;;  %v449_v41 = vadd.f32 %v448_v38, %v1853_v32  ;;  %v628_v63 = vmax.f32 %v362_v45, 0.0  ;;  %v630_v1 = vmax.f32 %v445_v46, 0.0 }
  0xfd   : > { %v367_v42 = vpop.f32.mrf.mxu0  ;;  %v450_v43 = vpop.f32.mrf.mxu1 }
  0xfe   : > { %v368_v47 = vadd.f32 %v367_v42, %v1853_v32  ;;  %v451_v48 = vadd.f32 %v450_v43, %v1853_v32  ;;  %v635_v59 = vmax.f32 %v366_v40, 0.0  ;;  %v637_v60 = vmax.f32 %v449_v41, 0.0 }
  0xff   : > { %v1867_v51 = vpop.f32.mrf.mxu0  ;;  %v1869_v52 = vpop.f32.mrf.mxu1 }
 0x100   : > { %v636_v55 = vmax.f32 %v368_v47, 0.0  ;;  %v638_v56 = vmax.f32 %v451_v48, 0.0  ;;  %v520_v50 = vadd.f32 %v1867_v51, %v1859_v44  ;;  %v603_v53 = vadd.f32 %v1869_v52, %v1859_v44 }
 0x101   : > { %v521_v61 = vpop.f32.mrf.mxu0  ;;  %v604_v62 = vpop.f32.mrf.mxu1 }
 0x102   : > { %706 = vmatprep.subr.mxu0 %v636_v55  ;;  %795 = vmatprep.subr.mxu1 %v638_v56  ;;  %v522_v47 = vadd.f32 %v521_v61, %v1859_v44  ;;  %v605_v48 = vadd.f32 %v604_v62, %v1859_v44  ;;  %v623_v51 = vmax.f32 %v520_v50, 0.0  ;;  %v646_v44 = vld [vmem:[%s2118_s2 + $0x18] sm:$0xff] }
 0x103   : > { %v525_v20 = vpop.f32.mrf.mxu0  ;;  %v608_v21 = vpop.f32.mrf.mxu1  ;;  %707 = vmatpush1.msra.mxu0 %v635_v59  ;;  %796 = vmatpush1.msra.mxu1 %v637_v60  ;;  %v625_v60 = vmax.f32 %v603_v53, 0.0 }
 0x104   : > { %708 = vmatprep.subr.mxu0 %v628_v63  ;;  %797 = vmatprep.subr.mxu1 %v630_v1  ;;  %v526_v42 = vadd.f32 %v525_v20, %v1855_v39  ;;  %v609_v43 = vadd.f32 %v608_v21, %v1855_v39  ;;  %v624_v58 = vmax.f32 %v522_v47, 0.0  ;;  %v626_v59 = vmax.f32 %v605_v48, 0.0 }
 0x105   : > { %v527_v26 = vpop.f32.mrf.mxu0  ;;  %v610_v27 = vpop.f32.mrf.mxu1  ;;  %709 = vmatpush1.msra.mxu0 %v627_v10  ;;  %798 = vmatpush1.msra.mxu1 %v629_v15 }
 0x106   : > { %710 = vmatprep.subr.mxu0 %v620_v22  ;;  %799 = vmatprep.subr.mxu1 %v622_v23  ;;  %v528_v40 = vadd.f32 %v527_v26, %v1855_v39  ;;  %v611_v41 = vadd.f32 %v610_v27, %v1855_v39  ;;  %v645_v39 = vld [vmem:[%s2118_s2 + $0x10] sm:$0xff]  ;;  %v631_v56 = vmax.f32 %v526_v42, 0.0  ;;  %v633_v57 = vmax.f32 %v609_v43, 0.0 }
 0x107   : > { %v531_v29 = vpop.f32.mrf.mxu0  ;;  %v614_v30 = vpop.f32.mrf.mxu1  ;;  %711 = vmatpush1.msra.mxu0 %v619_v24  ;;  %800 = vmatpush1.msra.mxu1 %v621_v25 }
 0x108   : > { %1321 = vmatmul.mubr.msk.f32.vlgmr.msra.gmra.mxu0 %vm667_vm1, %v1878_v28  ;;  %1325 = vmatmul.mubr.msk.f32.vlgmr.msra.gmra.mxu1 %vm667_vm1, %v1878_v28  ;;  %v532_v31 = vadd.f32 %v531_v29, %v1853_v32  ;;  %v615_v33 = vadd.f32 %v614_v30, %v1853_v32  ;;  %v632_v54 = vmax.f32 %v528_v40, 0.0  ;;  %v634_v55 = vmax.f32 %v611_v41, 0.0 }
 0x109   : > { %v533_v34 = vpop.f32.mrf.mxu0  ;;  %v616_v35 = vpop.f32.mrf.mxu1  ;;  %750 = vmatprep.mubr.f32.mxu0 %v1607_v0  ;;  %839 = vmatprep.mubr.f32.mxu1 %v1607_v0 }
 0x10a   : > { %v534_v37 = vadd.f32 %v533_v34, %v1853_v32  ;;  %v617_v38 = vadd.f32 %v616_v35, %v1853_v32  ;;  %v639_v49 = vmax.f32 %v532_v31, 0.0  ;;  %v641_v32 = vmax.f32 %v615_v33, 0.0  ;;  %v1959_v31 = vpop.permute.xlu0 %664 }
 0x10c   : > { %v640_v45 = vmax.f32 %v534_v37, 0.0  ;;  %v642_v46 = vmax.f32 %v617_v38, 0.0  ;;  %1322 = vmatmul.mubr.msk.f32.gmra.mxu0 %vm667_vm1, %v644_v36  ;;  %1326 = vmatmul.mubr.msk.f32.gmra.mxu1 %vm667_vm1, %v644_v36 }
 0x10d   : > { %756 = vmatprep.mubr.f32.mxu0 %v1607_v0  ;;  %845 = vmatprep.mubr.f32.mxu1 %v1607_v0 }
 0x10e   : > { %884 = vmatprep.subr.mxu0 %v640_v45  ;;  %973 = vmatprep.subr.mxu1 %v642_v46 }
 0x10f   : > { %885 = vmatpush1.msra.mxu0 %v639_v49  ;;  %974 = vmatpush1.msra.mxu1 %v641_v32 }
 0x110   : > { %1323 = vmatmul.mubr.msk.f32.gmra.mxu0 %vm667_vm1, %v645_v39  ;;  %1327 = vmatmul.mubr.msk.f32.gmra.mxu1 %vm667_vm1, %v645_v39 }
 0x111   : > { %886 = vmatprep.subr.mxu0 %v632_v54  ;;  %975 = vmatprep.subr.mxu1 %v634_v55 }
 0x112   : > { %887 = vmatpush1.msra.mxu0 %v631_v56  ;;  %976 = vmatpush1.msra.mxu1 %v633_v57 }
 0x113   : > { %888 = vmatprep.subr.mxu0 %v624_v58  ;;  %977 = vmatprep.subr.mxu1 %v626_v59 }
 0x114   : > { %762 = vmatprep.mubr.f32.mxu0 %v1607_v0  ;;  %851 = vmatprep.mubr.f32.mxu1 %v1607_v0 }
 0x115   : > { %889 = vmatpush1.msra.mxu0 %v623_v51  ;;  %978 = vmatpush1.msra.mxu1 %v625_v60 }
 0x116   : > { %1324 = vmatmul.mubr.msk.f32.gmra.mxu0 %vm667_vm1, %v646_v44  ;;  %1328 = vmatmul.mubr.msk.f32.gmra.mxu1 %vm667_vm1, %v646_v44 }
 0x117   : > { %922 = vmatprep.mubr.f32.mxu0 %v1607_v0  ;;  %1011 = vmatprep.mubr.f32.mxu1 %v1607_v0 }
 0x11a   : > { %1329 = vmatmul.mubr.msk.f32.vlgmr.msra.gmra.mxu0 %vm667_vm1, %v1878_v28  ;;  %1333 = vmatmul.mubr.msk.f32.vlgmr.msra.gmra.mxu1 %vm667_vm1, %v1878_v28 }
 0x11b   : > { %928 = vmatprep.mubr.f32.mxu0 %v1607_v0  ;;  %1017 = vmatprep.mubr.f32.mxu1 %v1607_v0 }
 0x11e   : > { %1330 = vmatmul.mubr.msk.f32.gmra.mxu0 %vm667_vm1, %v644_v36  ;;  %1334 = vmatmul.mubr.msk.f32.gmra.mxu1 %vm667_vm1, %v644_v36 }
 0x11f   : > { %934 = vmatprep.mubr.f32.mxu0 %v1607_v0  ;;  %1023 = vmatprep.mubr.f32.mxu1 %v1607_v0 }
 0x122   : > { %1331 = vmatmul.mubr.msk.f32.gmra.mxu0 %vm667_vm1, %v645_v39  ;;  %1335 = vmatmul.mubr.msk.f32.gmra.mxu1 %vm667_vm1, %v645_v39 }
 0x123   : > { %940 = vmatprep.mubr.f32.mxu0 %v1607_v0  ;;  %1029 = vmatprep.mubr.f32.mxu1 %v1607_v0  ;;  %v1953_v0 = vpop.permute.xlu1 %659 }
 0x126   : > { %1332 = vmatmul.mubr.msk.f32.gmra.mxu0 %vm667_vm1, %v646_v44  ;;  %1336 = vmatmul.mubr.msk.f32.gmra.mxu1 %vm667_vm1, %v646_v44 }
 0x1c8   : > { %v1937_v52 = vpop.f32.mrf.mxu0  ;;  %v1939_v61 = vpop.f32.mrf.mxu1 }
 0x1ca   : > { %v1941_v62 = vpop.f32.mrf.mxu0  ;;  %v1943_v63 = vpop.f32.mrf.mxu1 }
 0x1cc   : > { %v1945_v1 = vpop.f32.mrf.mxu0  ;;  %v1947_v10 = vpop.f32.mrf.mxu1 }
 0x1ce   : > { %v1949_v15 = vpop.f32.mrf.mxu0  ;;  %v1951_v20 = vpop.f32.mrf.mxu1 }
 0x1d0   : > { %v758_v21 = vpop.f32.mrf.mxu0  ;;  %v847_v22 = vpop.f32.mrf.mxu1 }
 0x1d1   : > { %v759_v23 = vadd.f32 %v758_v21, %v1953_v0  ;;  %v848_v24 = vadd.f32 %v847_v22, %v1953_v0 }
 0x1d2   : > { %v760_v25 = vpop.f32.mrf.mxu0  ;;  %v849_v26 = vpop.f32.mrf.mxu1 }
 0x1d3   : > { %v1337_v27 = vmul.f32 -1.442695, %v759_v23  ;;  %v1339_v28 = vmul.f32 -1.442695, %v848_v24  ;;  %v761_v29 = vadd.f32 %v760_v25, %v1953_v0  ;;  %v850_v30 = vadd.f32 %v849_v26, %v1953_v0 }
 0x1d5   : > { %1430 = vpow2.f32 %v1337_v27  ;;  %v1338_v33 = vmul.f32 -1.442695, %v761_v29  ;;  %v1340_v34 = vmul.f32 -1.442695, %v850_v30 }
 0x1d6   : > { %1432 = vpow2.f32 %v1339_v28  ;;  %v764_v35 = vpop.f32.mrf.mxu0  ;;  %v853_v36 = vpop.f32.mrf.mxu1 }
 0x1d7   : > { %1434 = vpow2.f32 %v1338_v33  ;;  %v765_v37 = vadd.f32 %v764_v35, %v1959_v31  ;;  %v854_v38 = vadd.f32 %v853_v36, %v1959_v31 }
 0x1d8   : > { %1436 = vpow2.f32 %v1340_v34  ;;  %v766_v40 = vpop.f32.mrf.mxu0  ;;  %v855_v41 = vpop.f32.mrf.mxu1 }
 0x1d9   : > { %v1345_v42 = vmul.f32 -1.442695, %v765_v37  ;;  %v1347_v43 = vmul.f32 -1.442695, %v854_v38  ;;  %v767_v45 = vadd.f32 %v766_v40, %v1959_v31  ;;  %v856_v46 = vadd.f32 %v855_v41, %v1959_v31 }
 0x1da   : > { %v1965_v47 = vpop.f32.mrf.mxu0  ;;  %v1967_v48 = vpop.f32.mrf.mxu1 }
 0x1db   : > { %1438 = vpow2.f32 %v1345_v42  ;;  %v1346_v49 = vmul.f32 -1.442695, %v767_v45  ;;  %v1348_v32 = vmul.f32 -1.442695, %v856_v46 }
 0x1dc   : > { %1440 = vpow2.f32 %v1347_v43  ;;  %v1969_v39 = vpop.f32.mrf.mxu0  ;;  %v1971_v50 = vpop.f32.mrf.mxu1 }
 0x1dd   : > { %1442 = vpow2.f32 %v1346_v49 }
 0x1de   : > { %1444 = vpow2.f32 %v1348_v32  ;;  %v1973_v53 = vpop.f32.mrf.mxu0  ;;  %v1975_v54 = vpop.f32.mrf.mxu1 }
 0x1e0   : > { %v1977_v55 = vpop.f32.mrf.mxu0  ;;  %v1979_v56 = vpop.f32.mrf.mxu1 }
 0x1e2   : > { %v1431_v57 = vpop.eup %1430  ;;  %v936_v58 = vpop.f32.mrf.mxu0 }
 0x1e3   : > { %v1025_v59 = vpop.f32.mrf.mxu1  ;;  %v1433_v51 = vpop.eup %1432  ;;  %v1100_v60 = vadd.f32 1.0, %v1431_v57  ;;  %v937_v44 = vadd.f32 %v936_v58, %v1953_v0 }
 0x1e4   : > { %v1435_v21 = vpop.eup %1434  ;;  %v1102_v22 = vadd.f32 1.0, %v1433_v51  ;;  %v1026_v23 = vadd.f32 %v1025_v59, %v1953_v0  ;;  %v938_v24 = vpop.f32.mrf.mxu0 }
 0x1e5   : > { %v1027_v25 = vpop.f32.mrf.mxu1  ;;  %v1437_v26 = vpop.eup %1436  ;;  %1446 = vrcp.f32 %v1100_v60  ;;  %v1101_v27 = vadd.f32 1.0, %v1435_v21  ;;  %v1341_v28 = vmul.f32 -1.442695, %v937_v44  ;;  %v939_v35 = vadd.f32 %v938_v24, %v1953_v0 }
 0x1e6   : > { %1448 = vrcp.f32 %v1102_v22  ;;  %v1103_v29 = vadd.f32 1.0, %v1437_v26  ;;  %v1343_v30 = vmul.f32 -1.442695, %v1026_v23  ;;  %v942_v33 = vpop.f32.mrf.mxu0  ;;  %v1028_v37 = vadd.f32 %v1027_v25, %v1953_v0  ;;  %v1988_v51 = vpop.permute.xlu1 %649 }
 0x1e7   : > { %v1031_v34 = vpop.f32.mrf.mxu1  ;;  %1450 = vrcp.f32 %v1101_v27  ;;  %v943_v42 = vadd.f32 %v942_v33, %v1959_v31  ;;  %v1342_v58 = vmul.f32 -1.442695, %v939_v35  ;;  %v747_v21 = vadd.f32 %v1937_v52, %v1988_v51 }
 0x1e8   : > { %v1439_v36 = vpop.eup %1438  ;;  %1452 = vrcp.f32 %v1103_v29  ;;  %v944_v38 = vpop.f32.mrf.mxu0  ;;  %v1032_v49 = vadd.f32 %v1031_v34, %v1959_v31  ;;  %v1344_v60 = vmul.f32 -1.442695, %v1028_v37  ;;  %v836_v23 = vadd.f32 %v1939_v61, %v1988_v51 }
 0x1e9   : > { %v1441_v40 = vpop.eup %1440  ;;  %v1108_v41 = vadd.f32 1.0, %v1439_v36  ;;  %1454 = vpow2.f32 %v1341_v28  ;;  %v1033_v43 = vpop.f32.mrf.mxu1  ;;  %v945_v59 = vadd.f32 %v944_v38, %v1959_v31  ;;  %v1349_v22 = vmul.f32 -1.442695, %v943_v42 }
 0x1ea   : > { %v1443_v45 = vpop.eup %1442  ;;  %v1110_v46 = vadd.f32 1.0, %v1441_v40  ;;  %1456 = vpow2.f32 %v1343_v30  ;;  %v1034_v44 = vadd.f32 %v1033_v43, %v1959_v31  ;;  %v1351_v24 = vmul.f32 -1.442695, %v1032_v49  ;;  %v1999_v29 = vpop.permute.xlu0 %654 }
 0x1eb   : > { %v1445_v32 = vpop.eup %1444  ;;  %1458 = vrcp.f32 %v1108_v41  ;;  %v1109_v57 = vadd.f32 1.0, %v1443_v45  ;;  %v749_v25 = vadd.f32 %v1941_v62, %v1988_v51  ;;  %v1350_v26 = vmul.f32 -1.442695, %v945_v59 }
 0x1ec   : > { %1460 = vrcp.f32 %v1110_v46  ;;  %v1111_v0 = vadd.f32 1.0, %v1445_v32  ;;  %v838_v27 = vadd.f32 %v1943_v63, %v1988_v51  ;;  %v1352_v31 = vmul.f32 -1.442695, %v1034_v44 }
 0x1ed   : > { %1462 = vrcp.f32 %v1109_v57  ;;  %v1036_v28 = vmax.f32 %v747_v21, 0.0  ;;  %v1038_v30 = vmax.f32 %v836_v23, 0.0  ;;  %v1037_v33 = vmax.f32 %v749_v25, 0.0 }
 0x1ee   : > { %1464 = vrcp.f32 %v1111_v0  ;;  %v753_v34 = vadd.f32 %v1945_v1, %v1999_v29  ;;  %v1039_v36 = vmax.f32 %v838_v27, 0.0  ;;  %v842_v63 = vadd.f32 %v1947_v10, %v1999_v29 }
 0x1ef   : > { %1466 = vpow2.f32 %v1342_v58  ;;  %v755_v40 = vadd.f32 %v1949_v15, %v1999_v29  ;;  %v844_v1 = vadd.f32 %v1951_v20, %v1999_v29 }
 0x1f0   : > { %1468 = vpow2.f32 %v1344_v60  ;;  %v1044_v32 = vmax.f32 %v753_v34, 0.0  ;;  %v1046_v57 = vmax.f32 %v842_v63, 0.0 }
 0x1f1   : > { %1470 = vpow2.f32 %v1349_v22  ;;  %v1045_v59 = vmax.f32 %v755_v40, 0.0  ;;  %v1047_v44 = vmax.f32 %v844_v1, 0.0  ;;  %v927_v40 = vadd.f32 %v1969_v39, %v1988_v51 }
 0x1f2   : > { %v1447_v52 = vpop.eup %1446  ;;  %1472 = vpow2.f32 %v1351_v24  ;;  %v1020_v1 = vadd.f32 %v1975_v54, %v1999_v29 }
 0x1f3   : > { %v1449_v61 = vpop.eup %1448  ;;  %v1148_v62 = vmul.f32 %v1447_v52, %v1036_v28  ;;  %1474 = vpow2.f32 %v1350_v26 }
 0x1f4   : > { %v1451_v35 = vpop.eup %1450  ;;  %v1150_v37 = vmul.f32 %v1449_v61, %v1038_v30  ;;  %1476 = vpow2.f32 %v1352_v31 }
 0x1f5   : > { %v1453_v38 = vpop.eup %1452  ;;  %v1164_v41 = vadd.f32 %v1148_v62, %v1758_v8  ;;  %v1149_v42 = vmul.f32 %v1451_v35, %v1037_v33  ;;  %v925_v62 = vadd.f32 %v1965_v47, %v1988_v51  ;;  %v1014_v35 = vadd.f32 %v1967_v48, %v1988_v51 }
 0x1f6   : > { %v1455_v43 = vpop.eup %1454  ;;  %v1166_v45 = vadd.f32 %v1150_v37, %v1761_v9  ;;  %v1151_v46 = vmul.f32 %v1453_v38, %v1039_v36  ;;  %v1016_v47 = vadd.f32 %v1971_v50, %v1988_v51  ;;  %v931_v48 = vadd.f32 %v1973_v53, %v1999_v29 }
 0x1f7   : > { %v1457_v49 = vpop.eup %1456  ;;  %1180 = vst [vmem:[%s2013_s27] sm:$0xff] %v1164_v41  ;;  %v1165_v8 = vadd.f32 %v1149_v42, %v1750_v6  ;;  %v1104_v10 = vadd.f32 1.0, %v1455_v43  ;;  %v1040_v36 = vmax.f32 %v925_v62, 0.0  ;;  %v1042_v37 = vmax.f32 %v1014_v35, 0.0 }
 0x1f8   : > { %v1459_v15 = vpop.eup %1458  ;;  %1182 = vst [vmem:[%s2013_s27 + $0x10] sm:$0xff] %v1166_v45  ;;  %v1167_v20 = vadd.f32 %v1151_v46, %v1753_v7  ;;  %v1106_v9 = vadd.f32 1.0, %v1457_v49  ;;  %v1041_v46 = vmax.f32 %v927_v40, 0.0  ;;  %v933_v49 = vadd.f32 %v1977_v55, %v1999_v29 }
 0x1f9   : > { %v1461_v58 = vpop.eup %1460  ;;  %1181 = vst [vmem:[%s2013_s27 + $0x8] sm:$0xff] %v1165_v8  ;;  %v1156_v0 = vmul.f32 %v1459_v15, %v1044_v32  ;;  %1478 = vrcp.f32 %v1104_v10  ;;  %v1043_v32 = vmax.f32 %v1016_v47, 0.0  ;;  %v1022_v50 = vadd.f32 %v1979_v56, %v1999_v29 }
 0x1fa   : > { %v1463_v60 = vpop.eup %1462  ;;  %1183 = vst [vmem:[%s2013_s27 + $0x18] sm:$0xff] %v1167_v20  ;;  %v1158_v21 = vmul.f32 %v1461_v58, %v1046_v57  ;;  %1480 = vrcp.f32 %v1106_v9  ;;  %v1050_v8 = vmax.f32 %v1020_v1, 0.0  ;;  %v1049_v15 = vmax.f32 %v933_v49, 0.0 }
 0x1fb   : > { %v1465_v6 = vpop.eup %1464  ;;  %v1172_v22 = vadd.f32 %v1156_v0, %v1742_v4  ;;  %v1157_v23 = vmul.f32 %v1463_v60, %v1045_v59  ;;  %v1051_v9 = vmax.f32 %v1022_v50, 0.0 }
 0x1fc   : > { %v1467_v24 = vpop.eup %1466  ;;  %v1174_v7 = vadd.f32 %v1158_v21, %v1747_v5  ;;  %v1159_v25 = vmul.f32 %v1465_v6, %v1047_v44 }
 0x1fd   : > { %v1469_v26 = vpop.eup %1468  ;;  %1188 = vst [vmem:[%s2013_s27 + $0x40] sm:$0xff] %v1172_v22  ;;  %v1173_v27 = vadd.f32 %v1157_v23, %v1736_v2  ;;  %v1105_v31 = vadd.f32 1.0, %v1467_v24 }
 0x1fe   : > { %v1471_v28 = vpop.eup %1470  ;;  %1190 = vst [vmem:[%s2013_s27 + $0x50] sm:$0xff] %v1174_v7  ;;  %v1175_v52 = vadd.f32 %v1159_v25, %v1739_v3  ;;  %v1107_v30 = vadd.f32 1.0, %v1469_v26 }
 0x1ff   : > { %v1473_v61 = vpop.eup %1472  ;;  %1189 = vst [vmem:[%s2013_s27 + $0x48] sm:$0xff] %v1173_v27  ;;  %1482 = vrcp.f32 %v1105_v31  ;;  %v1112_v4 = vadd.f32 1.0, %v1471_v28 }
 0x200   : > { %v1475_v33 = vpop.eup %1474  ;;  %1191 = vst [vmem:[%s2013_s27 + $0x58] sm:$0xff] %v1175_v52  ;;  %1484 = vrcp.f32 %v1107_v30  ;;  %v1114_v34 = vadd.f32 1.0, %v1473_v61 }
 0x201   : > { %v1477_v5 = vpop.eup %1476  ;;  %1486 = vrcp.f32 %v1112_v4  ;;  %v1113_v2 = vadd.f32 1.0, %v1475_v33 }
 0x202   : > { %1488 = vrcp.f32 %v1114_v34  ;;  %v1115_v3 = vadd.f32 1.0, %v1477_v5 }
 0x203   : > { %1490 = vrcp.f32 %v1113_v2 }
 0x204   : > { %1492 = vrcp.f32 %v1115_v3 }
 0x206   : > { %v1479_v63 = vpop.eup %1478 }
 0x207   : > { %v1481_v38 = vpop.eup %1480  ;;  %v1152_v41 = vmul.f32 %v1479_v63, %v1040_v36 }
 0x208   : > { %v1154_v42 = vmul.f32 %v1481_v38, %v1042_v37 }
 0x209   : > { %v1168_v43 = vadd.f32 %v1152_v41, %v1802_v18  ;;  %v1048_v18 = vmax.f32 %v931_v48, 0.0 }
 0x20a   : > { %v1170_v45 = vadd.f32 %v1154_v42, %v1805_v19 }
 0x20b   : > { %1184 = vst [vmem:[%s2013_s27 + $0x20] sm:$0xff] %v1168_v43 }
 0x20c   : > { %v1483_v39 = vpop.eup %1482  ;;  %1186 = vst [vmem:[%s2013_s27 + $0x30] sm:$0xff] %v1170_v45 }
 0x20d   : > { %v1485_v53 = vpop.eup %1484  ;;  %v1153_v51 = vmul.f32 %v1483_v39, %v1041_v46 }
 0x20e   : > { %v1487_v54 = vpop.eup %1486  ;;  %v1155_v19 = vmul.f32 %v1485_v53, %v1043_v32 }
 0x20f   : > { %v1489_v10 = vpop.eup %1488  ;;  %v1169_v55 = vadd.f32 %v1153_v51, %v1794_v16  ;;  %v1160_v57 = vmul.f32 %v1487_v54, %v1048_v18 }
 0x210   : > { %v1491_v20 = vpop.eup %1490  ;;  %v1171_v56 = vadd.f32 %v1155_v19, %v1797_v17  ;;  %v1162_v29 = vmul.f32 %v1489_v10, %v1050_v8 }
 0x211   : > { %v1493_v58 = vpop.eup %1492  ;;  %1185 = vst [vmem:[%s2013_s27 + $0x28] sm:$0xff] %v1169_v55  ;;  %v1176_v59 = vadd.f32 %v1160_v57, %v1779_v13  ;;  %v1161_v0 = vmul.f32 %v1491_v20, %v1049_v15 }
 0x212   : > { %1187 = vst [vmem:[%s2013_s27 + $0x38] sm:$0xff] %v1171_v56  ;;  %v1178_v16 = vadd.f32 %v1162_v29, %v1782_v14  ;;  %v1163_v60 = vmul.f32 %v1493_v58, %v1051_v9 }
 0x213   : > { %1192 = vst [vmem:[%s2013_s27 + $0x60] sm:$0xff] %v1176_v59  ;;  %v1177_v44 = vadd.f32 %v1161_v0, %v1771_v11 }
 0x214   : > { %1194 = vst [vmem:[%s2013_s27 + $0x70] sm:$0xff] %v1178_v16  ;;  %v1179_v13 = vadd.f32 %v1163_v60, %v1774_v12 }
 0x215   : > { %1193 = vst [vmem:[%s2013_s27 + $0x68] sm:$0xff] %v1177_v44 }
 0x216   : > { %1195 = vst [vmem:[%s2013_s27 + $0x78] sm:$0xff] %v1179_v13 }
 0x217   : > { %1535 = shalt.err (!%p1532_p6)
}
 0x218   : > { %s1536_s26 = scalar_lea.hbm %s2062_s18, 2048  ;;  %s1540_s8 = scalar_lea.hbm %s2120_s4, 4096 }
 0x219   : > { %p1537_p7 = scmp.ne.s32.totalorder %s2062_s18, %s1536_s26  ;;  %p1541_p13 = scmp.lt.s32.totalorder %s2062_s18, %s2120_s4 }
 0x21a   : > { %p1542_p2 = scmp.lt.s32.totalorder %s1540_s8, %s1536_s26 }
 0x21b   : > { %p1538_p10 = pnand %p1537_p7, %p1688_p9 }
 0x21c   : > { %p1543_p8 = por %p1542_p2, %p1541_p13 }
 0x21d   : > { %p1539_p4 = pneg %p1538_p10 }
 0x21f   : > { %p1544_p12 = pnand %p1543_p8, %p1539_p4 }
 0x221   : > { %1547 = shalt.err (!%p1544_p12)
}
 0x222   : > { %s1610_s7 = smov 1024   ;;  %s1611_s11 = smov 64  }
 0x223   : > { %1362 = dma.vmem_to_hbm [thread:$0]  (%p1688_p9), %s2064_s10, 2048, %s2062_s18, %s1197_s13, %s1610_s7, %s1610_s7, %s1611_s11  }
 0x224 PF: > { %s1227_s12 = sand.u32 1, %s1582_s15   ;;  %p2126_p0 = scmp.ge.s32.totalorder %s1602_s20, 2 }
 0x225   : > { %s1228_s14 = scalar_lea.sflag [#allocation4], %s1227_s12 }
 0x226   : > { %p1369_p1 = pnand %p2126_p0, %p1695_p11 }
 0x228   : > { %p1370_p3 = pneg %p1369_p1 }
 0x22a   : > { %1577 = dma.done.wait (%p1370_p3), %s1228_s14, 2048  }
 0x22b   : > { %1579 = vsyncadd (%p1370_p3), %s1228_s14, 4294965248  ;;  %s20_s20 = sadd.s32 1, %s1602_s20   ;;  %s2127_s15 = smov %s1586_s16 }
 0x22c   : > { %p17_p5 = scmp.ge.s32.totalorder %s20_s20, 4   ;;  %s2128_s16 = smov %s1590_s17 }
 0x22d   : > { %s2129_s17 = smov %s1693_s29  ;;  %s2130_s18 = smov %s1598_s19 }
 0x22e   : > { %s2131_s19 = smov %s2133_s23  ;;  %19 = sbr.rel (!%p17_p5) target bundleno = 6 (0x6), region = 81 }
 0x233   :  { %1233 = vsyncpa [#allocation3], 1 }
 0x234   :  { %1235 = vsyncpa [#allocation3 + $0x1], 1 }
 0x235   :  { %1236 = vsyncpa [#allocation4], 1 }
 0x236   :  { %1238 = vsyncpa [#allocation4 + $0x1], 1 }

</bundles_post_ra>
